<compile_context>
chip_gen: v7x
topology: tpu7x:2x2x1
jax: 0.10.0
libtpu: 0.0.40
codegen_flags: <defaults>
</compile_context>

<pallas_src>
import jax
import jax.numpy as jnp
from jax.experimental import pallas as pl
from jax.experimental.pallas import tpu as pltpu


def _round_up(x, m):
    return ((x + m - 1) // m) * m


def _masked_mse_kernel(pred_ref, tgt_ref, mask_ref, out_ref, acc_ref):
    """One (batch, seq-tile) grid step of the fused masked-MSE reduction.

    pred_ref : (1, TL, D) VMEM, native dtype -- predictions[:, :-1] tile
    tgt_ref  : (1, TL, D) VMEM, native dtype -- inputs[:, 1:] tile
    mask_ref : (1, TL, 1) VMEM f32 {0,1}     -- pre-ANDed step-validity mask
    out_ref  : (1, 8, 128) VMEM f32          -- per-batch (num, den) partials
                                                (sublane 0 = num, sublane 1 = den)
    acc_ref  : (2,) SMEM f32 scratch         -- running (num, den) along L
    """
    l = pl.program_id(1)

    @pl.when(l == 0)
    def _init():
        acc_ref[0] = jnp.float32(0.0)
        acc_ref[1] = jnp.float32(0.0)

    # Upcast in vregs (free VPU work; required on v5e which has no bf16 VALU).
    p = pred_ref[...].astype(jnp.float32)
    t = tgt_ref[...].astype(jnp.float32)
    m = mask_ref[...]                       # (1, TL, 1), broadcasts over D
    d = p - t
    acc_ref[0] += jnp.sum(d * d * m)        # masked per-element squared error
    acc_ref[1] += jnp.sum(m)                # number of valid steps in the tile

    # Publish the running (num, den) into the resident output tile every step
    # (matmul-style unconditional write; no reliance on last-step-only stores).
    sub = jax.lax.broadcasted_iota(jnp.int32, out_ref.shape, 1)
    out_ref[...] = jnp.where(
        sub == 0, acc_ref[0],
        jnp.where(sub == 1, acc_ref[1], jnp.float32(0.0)))


class BaseLossPallas:
    """Concretized BaseLoss (next-step MSE) with forward fused in Pallas."""

    # Per-input VMEM tile budget.  2 MiB/input * 2 inputs * 2 pipeline buffers
    # = 8 MiB, well under the 16 MiB (v5e) / 32 MiB (v6e, v7x) scoped defaults.
    _MAX_TILE_BYTES = 2 * 1024 * 1024
    _MAX_TILE_ROWS = 512

    def __init__(self, input_size, target_size, grad_scale=None):
        # BaseLoss.__init__ stores only these scalars -- no learnable weights.
        self._input_size = input_size
        self._target_size = target_size
        self._grad_scale = grad_scale  # backward-only effect; identity in forward

    @property
    def input_size(self):
        return self._input_size

    @property
    def target_size(self):
        return self._target_size

    def forward(self, inputs, predictions, mask=None, reduction="mean"):
        if reduction != "mean":
            raise ValueError(f"Only 'mean' reduction is fused in the kernel, got: {reduction}.")
        assert inputs.ndim == 3 and predictions.shape == inputs.shape
        B, L, D = inputs.shape
        assert L >= 2, "need at least two timesteps for next-step prediction"
        if mask is None:
            mask = jnp.ones((B, L), dtype=jnp.float32)
        assert mask.shape == (B, L)

        # --- wrapper-side prep (keeps the kernel pure aligned elementwise+reduce) ---
        # Shift-by-one OUTSIDE the kernel: in-kernel 1-step slices along the
        # sublane axis would force relayout copies.
        tgt = inputs[:, 1:, :]                 # (B, L-1, D), native dtype
        prd = predictions[:, :-1, :]           # (B, L-1, D), native dtype
        m = mask.astype(jnp.float32)
        step_mask = (m[:, :-1] * m[:, 1:])[..., None]   # (B, L-1, 1) f32 {0,1}

        Lp = L - 1
        # Tile rows: as large as allowed by the per-input byte budget, capped at
        # 512 rows, rounded to a multiple of 8 (sublane), shrunk for short seqs.
        row_bytes = max(D, 1) * 4  # size for the f32 upper bound
        tl = self._MAX_TILE_BYTES // row_bytes
        tl = max(8, min(self._MAX_TILE_ROWS, (tl // 8) * 8))
        tl = min(tl, _round_up(Lp, 8))
        l_pad = _round_up(Lp, tl)
        if l_pad != Lp:
            pad = ((0, 0), (0, l_pad - Lp), (0, 0))
            tgt = jnp.pad(tgt, pad)
            prd = jnp.pad(prd, pad)
            step_mask = jnp.pad(step_mask, pad)   # zero mask => padding contributes nothing
        n_l = l_pad // tl

        partials = pl.pallas_call(
            _masked_mse_kernel,
            out_shape=jax.ShapeDtypeStruct((B, 8, 128), jnp.float32),
            grid_spec=pltpu.PrefetchScalarGridSpec(
                num_scalar_prefetch=0,
                grid=(B, n_l),
                in_specs=[
                    pl.BlockSpec((1, tl, D), lambda b, l: (b, l, 0)),
                    pl.BlockSpec((1, tl, D), lambda b, l: (b, l, 0)),
                    pl.BlockSpec((1, tl, 1), lambda b, l: (b, l, 0)),
                ],
                out_specs=pl.BlockSpec((1, 8, 128), lambda b, l: (b, 0, 0)),
                scratch_shapes=[pltpu.SMEM((2,), jnp.float32)],
            ),
            compiler_params=pltpu.CompilerParams(
                dimension_semantics=("parallel", "arbitrary")),
        )(prd, tgt, step_mask)

        # Tiny XLA epilogue: combine per-batch partials, fold the /D of the
        # per-step mean into the single final normalization.
        num = jnp.sum(partials[:, 0, 0])
        den = jnp.sum(partials[:, 1, 0])
        loss = num / (den * jnp.float32(D))

        # TODO(synk): ScaleGradient only rescales gradients in backward; forward is
        # identity.  Training-time grad scaling would need a custom_vjp around this.
        metrics = {}
        return loss, metrics


def _reference_loss(inputs, predictions, mask):
    """Pure-JAX reference of the concretized BaseLoss.forward."""
    diff = predictions[:, :-1].astype(jnp.float32) - inputs[:, 1:].astype(jnp.float32)
    per_step = jnp.mean(diff * diff, axis=-1)
    m = (mask[:, :-1] & mask[:, 1:]).astype(jnp.float32)
    return jnp.sum(per_step * m) / jnp.sum(m)


if __name__ == "__main__":
    key = jax.random.PRNGKey(0)

    # Case 1: small module-sized shapes (f32).  Case 2: longer sequence (bf16)
    # to exercise multi-tile accumulation, padding and the in-kernel upcast.
    cases = [
        (2, 8, 32, jnp.float32),
        (2, 1025, 16, jnp.bfloat16),
    ]

    all_ok = True
    for (B, L, D, dtype) in cases:
        key, k_in, k_pr, k_len = jax.random.split(key, 4)
        inputs = jax.random.normal(k_in, (B, L, D), dtype=dtype)
        predictions = jax.random.normal(k_pr, (B, L, D), dtype=dtype)
        lengths = jax.random.randint(k_len, (B,), minval=2, maxval=L + 1)
        mask = jnp.arange(L)[None, :] < lengths[:, None]       # (B, L) bool

        loss_mod = BaseLossPallas(input_size=D, target_size=D, grad_scale=0.5)
        loss, _metrics = loss_mod.forward(inputs, predictions, mask, reduction="mean")
        loss = jax.block_until_ready(loss)

        ref = _reference_loss(inputs, predictions, mask)
        ok = bool(jnp.allclose(loss, ref, rtol=1e-4, atol=1e-5))
        all_ok = all_ok and ok

    assert all_ok, "Pallas loss does not match the pure-JAX reference"
    print("KERNEL_OK")
</pallas_src>

<mosaic_0001>
module attributes {stable_mosaic.version = 11 : i64} {
  func.func @_masked_mse_kernel(%arg0: i32, %arg1: i32, %arg2: memref<1x8x32xf32, #tpu.memory_space<vmem>>, %arg3: memref<1x8x32xf32, #tpu.memory_space<vmem>>, %arg4: memref<1x8x1xf32, #tpu.memory_space<vmem>>, %arg5: memref<1x8x128xf32, #tpu.memory_space<vmem>>, %arg6: memref<2xf32, #tpu.memory_space<smem>>) attributes {dimension_semantics = [#tpu.dimension_semantics<parallel>, #tpu.dimension_semantics<arbitrary>], iteration_bounds = array<i64: 2, 1>, scalar_prefetch = 0 : i64, scratch_operands = 1 : i64, tpu.core_type = #tpu.core_type<tc>, window_params = [{transform_indices = @transform_0, window_bounds = array<i64: 1, 8, 32>}, {transform_indices = @transform_1, window_bounds = array<i64: 1, 8, 32>}, {transform_indices = @transform_2, window_bounds = array<i64: 1, 8, 1>}, {transform_indices = @transform_3, window_bounds = array<i64: 1, 8, 128>}]} {
    %c0_i32 = arith.constant 0 : i32
    %0 = arith.cmpi eq, %arg1, %c0_i32 : i32
    %1 = arith.extui %0 : i1 to i32
    %c0_i32_0 = arith.constant 0 : i32
    %2 = arith.cmpi ne, %1, %c0_i32_0 : i32
    scf.if %2 {
      %cst_20 = arith.constant 0.000000e+00 : f32
      %c0_21 = arith.constant 0 : index
      %37 = memref.load %arg6[%c0_21] : memref<2xf32, #tpu.memory_space<smem>>
      memref.store %cst_20, %arg6[%c0_21] : memref<2xf32, #tpu.memory_space<smem>>
      %cst_22 = arith.constant 0.000000e+00 : f32
      %c1_23 = arith.constant 1 : index
      %38 = memref.load %arg6[%c1_23] : memref<2xf32, #tpu.memory_space<smem>>
      memref.store %cst_22, %arg6[%c1_23] : memref<2xf32, #tpu.memory_space<smem>>
    } else {
    }
    %c0 = arith.constant 0 : index
    %c0_1 = arith.constant 0 : index
    %c0_2 = arith.constant 0 : index
    %3 = vector.load %arg2[%c0, %c0_1, %c0_2] : memref<1x8x32xf32, #tpu.memory_space<vmem>>, vector<1x8x32xf32>
    %c0_3 = arith.constant 0 : index
    %c0_4 = arith.constant 0 : index
    %c0_5 = arith.constant 0 : index
    %4 = vector.load %arg3[%c0_3, %c0_4, %c0_5] : memref<1x8x32xf32, #tpu.memory_space<vmem>>, vector<1x8x32xf32>
    %c0_6 = arith.constant 0 : index
    %c0_7 = arith.constant 0 : index
    %c0_8 = arith.constant 0 : index
    %5 = vector.load %arg4[%c0_6, %c0_7, %c0_8] : memref<1x8x1xf32, #tpu.memory_space<vmem>>, vector<1x8x1xf32>
    %6 = arith.subf %3, %4 : vector<1x8x32xf32>
    %c0_9 = arith.constant 0 : index
    %7 = memref.load %arg6[%c0_9] : memref<2xf32, #tpu.memory_space<smem>>
    %8 = arith.mulf %6, %6 : vector<1x8x32xf32>
    %9 = vector.broadcast %5 : vector<1x8x1xf32> to vector<1x8x32xf32>
    %10 = arith.mulf %8, %9 : vector<1x8x32xf32>
    %11 = vector.shape_cast %10 : vector<1x8x32xf32> to vector<1x1x8x32xf32>
    %cst = arith.constant dense<0.000000e+00> : vector<1xf32>
    %12 = vector.multi_reduction <add>, %11, %cst [1, 2, 3] : vector<1x1x8x32xf32> to vector<1xf32>
    %13 = vector.shape_cast %12 : vector<1xf32> to vector<1x1x1x1xf32>
    %14 = vector.extract %13[0, 0, 0, 0] : f32 from vector<1x1x1x1xf32>
    %15 = arith.addf %7, %14 : f32
    %c0_10 = arith.constant 0 : index
    %16 = memref.load %arg6[%c0_10] : memref<2xf32, #tpu.memory_space<smem>>
    memref.store %15, %arg6[%c0_10] : memref<2xf32, #tpu.memory_space<smem>>
    %c1 = arith.constant 1 : index
    %17 = memref.load %arg6[%c1] : memref<2xf32, #tpu.memory_space<smem>>
    %18 = vector.shape_cast %5 : vector<1x8x1xf32> to vector<1x1x8x1xf32>
    %cst_11 = arith.constant dense<0.000000e+00> : vector<1xf32>
    %19 = vector.multi_reduction <add>, %18, %cst_11 [1, 2, 3] : vector<1x1x8x1xf32> to vector<1xf32>
    %20 = vector.shape_cast %19 : vector<1xf32> to vector<1x1x1x1xf32>
    %21 = vector.extract %20[0, 0, 0, 0] : f32 from vector<1x1x1x1xf32>
    %22 = arith.addf %17, %21 : f32
    %c1_12 = arith.constant 1 : index
    %23 = memref.load %arg6[%c1_12] : memref<2xf32, #tpu.memory_space<smem>>
    memref.store %22, %arg6[%c1_12] : memref<2xf32, #tpu.memory_space<smem>>
    %24 = tpu.iota {dimensions = array<i32: 1>} : vector<1x8x128xi32>
    %c0_i32_13 = arith.constant 0 : i32
    %25 = vector.broadcast %c0_i32_13 : i32 to vector<1x8x128xi32>
    %26 = arith.cmpi eq, %24, %25 : vector<1x8x128xi32>
    %c0_14 = arith.constant 0 : index
    %27 = memref.load %arg6[%c0_14] : memref<2xf32, #tpu.memory_space<smem>>
    %c1_i32 = arith.constant 1 : i32
    %28 = vector.broadcast %c1_i32 : i32 to vector<1x8x128xi32>
    %29 = arith.cmpi eq, %24, %28 : vector<1x8x128xi32>
    %c1_15 = arith.constant 1 : index
    %30 = memref.load %arg6[%c1_15] : memref<2xf32, #tpu.memory_space<smem>>
    %cst_16 = arith.constant 0.000000e+00 : f32
    %31 = vector.broadcast %30 : f32 to vector<1x8x128xf32>
    %32 = vector.broadcast %cst_16 : f32 to vector<1x8x128xf32>
    %33 = arith.select %29, %31, %32 : vector<1x8x128xi1>, vector<1x8x128xf32>
    %34 = vector.broadcast %27 : f32 to vector<1x8x128xf32>
    %35 = arith.select %26, %34, %33 : vector<1x8x128xi1>, vector<1x8x128xf32>
    %c0_17 = arith.constant 0 : index
    %c0_18 = arith.constant 0 : index
    %c0_19 = arith.constant 0 : index
    %36 = vector.load %arg5[%c0_17, %c0_18, %c0_19] : memref<1x8x128xf32, #tpu.memory_space<vmem>>, vector<1x8x128xf32>
    tpu.vector_store %arg5[%c0_17, %c0_18, %c0_19], %35 {strides = array<i32>} : memref<1x8x128xf32, #tpu.memory_space<vmem>>, vector<1x8x128xf32>,
    return
  }
  func.func @transform_0(%arg0: i32, %arg1: i32) -> (i32, i32, i32) {
    %c0_i32 = arith.constant 0 : i32
    %c0_i32_0 = arith.constant 0 : i32
    return %arg0, %arg1, %c0_i32 : i32, i32, i32
  }
  func.func @transform_1(%arg0: i32, %arg1: i32) -> (i32, i32, i32) {
    %c0_i32 = arith.constant 0 : i32
    %c0_i32_0 = arith.constant 0 : i32
    return %arg0, %arg1, %c0_i32 : i32, i32, i32
  }
  func.func @transform_2(%arg0: i32, %arg1: i32) -> (i32, i32, i32) {
    %c0_i32 = arith.constant 0 : i32
    %c0_i32_0 = arith.constant 0 : i32
    return %arg0, %arg1, %c0_i32 : i32, i32, i32
  }
  func.func @transform_3(%arg0: i32, %arg1: i32) -> (i32, i32, i32) {
    %c0_i32 = arith.constant 0 : i32
    %c0_i32_0 = arith.constant 0 : i32
    %c0_i32_1 = arith.constant 0 : i32
    return %arg0, %c0_i32, %c0_i32_0 : i32, i32, i32
  }
}

</mosaic_0001>

<bundles_post_ra>
// kernel: tpu_custom_call.1
= control target key start
LH: loop header
LB: loop body
LE: loop exit
PB: predicated region body
PF: predicated region fallthrough
CT: control target
= control target key end

     0   :  { %8 = vsyncpa [#allocation4], 0  ;;  %s846_s0 = inlined_call_operand.vmem [shape: f32[2,8,32], index: 0, kind: input, shape index: {}]   ;;  %s847_s1 = inlined_call_operand.hbm [shape: f32[2,8,32], index: 1, kind: input, shape index: {}]   ;;  %s848_s2 = inlined_call_operand.vmem [shape: f32[2,8,1], index: 2, kind: input, shape index: {}]   ;;  %s849_s3 = inlined_call_operand.hbm [shape: f32[2,8,128], index: 3, kind: output, shape index: {}]  }
   0x1   :  { %10 = vsyncpa [#allocation4 + $0x1], 0 }
   0x2   :  { %11 = vsyncpa [#allocation5], 0 }
   0x3   :  { %13 = vsyncpa [#allocation5 + $0x1], 0  ;;  %s662_s12 = smov 0   ;;  %s664_s13 = smov 0  }
   0x4   :  { %s666_s14 = smov 0   ;;  %s668_s15 = smov 0  }
   0x5   :  { %s670_s16 = smov 0   ;;  %s672_s17 = smov 0  }
   0x6 LB: > { %s440_s18 = sadd.s32 4294967295, %s637_s17   ;;  %s441_s19 = sadd.s32 4294967294, %s637_s17   ;;  %s637_s17 = sphi %s672_s17, %s19_s17   ;;  %s633_s16 = sphi %s670_s16, %s865_s16   ;;  %s629_s15 = sphi %s668_s15, %s864_s15   ;;  %s625_s14 = sphi %s666_s14, %s863_s14   ;;  %s621_s13 = sphi %s664_s13, %s862_s13   ;;  %s617_s12 = sphi %s662_s12, %s861_s12  }
   0x7   : > { %s31_s20 = sadd.s32 1, %s633_s16  ;;  %s68_s21 = sadd.s32 1, %s625_s14 }
   0x8   : > { %p33_p0 = scmp.ge.s32.totalorder %s31_s20, 2  ;;  %p75_p1 = scmp.ne.s32.totalorder %s625_s14, %s621_s13 }
   0x9   : > { %p76_p2 = scmp.eq.s32.totalorder %s637_s17, 0  ;;  %p81_p3 = scmp.ne.s32.totalorder %s621_s13, %s617_s12 }
   0xa   : > { %s867_s20 = smov (%p33_p0, %s31_s20), 0  ;;  %p82_p5 = scmp.eq.s32.totalorder %s440_s18, 0 }
   0xb   : > { %p703_p4 = por %p76_p2, %p75_p1  ;;  %s63_s23 = ssub.s32 %s633_s16, %s867_s20 }
   0xc   : > { %p133_p6 = scmp.eq.s32.totalorder %s440_s18, 1  ;;  %p66_p7 = scmp.eq.s32.totalorder %s63_s23, 0 }
   0xd   : > { %p709_p8 = por %p82_p5, %p81_p3  ;;  %p139_p10 = scmp.eq.s32.totalorder %s441_s19, 1 }
   0xe   : > { %p713_p9 = por %p133_p6, %p75_p1  ;;  %p473_p13 = scmp.lt.s32.totalorder %s637_s17, 2 }
   0xf   : > { %s718_s26 = scalar_select %p66_p7, %s625_s14, %s68_s21  }
  0x10   : > { %s853_s25 = scalar_select %p713_p9, 1, 0 }
  0x11   : > { %p720_p11 = por %p139_p10, %p81_p3  ;;  %s169_s28 = sand.u32 1, %s625_s14  }
  0x12   : > { %s444_s29 = sshll.u32 %s169_s28, 3  ;;  %s445_s30 = sshll.u32 %s633_s16, 7 }
  0x13   : > { %s854_s27 = scalar_select %p720_p11, 1, 0 }
  0x14   : > { %s731_s6 = scalar_lea.hbm %s847_s1, %s445_s30  ;;  %s173_s7 = scalar_lea.vmem [#allocation3], %s444_s29 }
  0x15   : > { %s181_s8 = sshll.u32 %s173_s7, 4  ;;  %p737_p0 = pnand %p473_p13, %p703_p4  ;;  %s733_s8 = int_to_ptr.vmem [resolvable:$true] %s181_s8 }
  0x16   : > { %s170_s10 = scalar_lea.sflag [#allocation4], %s169_s28  ;;  %s525_s11 = scalar_lea.hbm %s731_s6, 128 }
  0x17   : > { %p526_p3 = scmp.ne.s32.totalorder %s731_s6, %s525_s11  ;;  %p527_p5 = pneg %p737_p0 }
  0x18   : > { %s530_s21 = scalar_lea.hbm %s847_s1, 256  ;;  %p531_p4 = scmp.lt.u32.totalorder %s731_s6, %s847_s1 }
  0x19   : > { %p528_p6 = pnand %p527_p5, %p526_p3  ;;  %p532_p10 = scmp.lt.u32.totalorder %s530_s21, %s525_s11 }
  0x1a   : > { %p534_p12 = scmp.lt.u32.totalorder %s525_s11, %s731_s6 }
  0x1b   : > { %p529_p7 = pneg %p528_p6  ;;  %p533_p13 = por %p532_p10, %p531_p4 }
  0x1d   : > { %p535_p1 = por %p534_p12, %p533_p13 }
  0x1f   : > { %p536_p2 = pnand %p535_p1, %p529_p7 }
  0x21   : > { %539 = shalt.err (!%p536_p2)
}
  0x22   : > { %s540_s28 = scalar_lea.vmem %s733_s8, 128  ;;  %s639_s29 = smov [#allocation3]  }
  0x23   : > { %p541_p3 = scmp.ne.s32.totalorder %s733_s8, %s540_s28  ;;  %s545_s30 = sshll.u32 %s639_s29, 4  ;;  %s546_s30 = int_to_ptr.vmem [resolvable:$false] %s545_s30 }
  0x24   : > { %s547_s4 = scalar_lea.vmem %s546_s30, 256  ;;  %p548_p9 = scmp.lt.s32.totalorder %s733_s8, %s546_s30 }
  0x25   : > { %p543_p6 = pnand %p541_p3, %p527_p5  ;;  %p549_p4 = scmp.lt.s32.totalorder %s547_s4, %s540_s28 }
  0x27   : > { %p544_p11 = pneg %p543_p6  ;;  %p550_p10 = por %p549_p4, %p548_p9 }
  0x29   : > { %p551_p12 = pnand %p550_p10, %p544_p11 }
  0x2b   : > { %554 = shalt.err (!%p551_p12)
}
  0x2c   : > { %468 = dma.hbm_to_vmem [thread:$0]  (!%p737_p0), %s731_s6, 128, %s733_s8, %s170_s10  }
  0x2d   : > { %p856_p1 = scmp.lt.s32.totalorder %s637_s17, 3  ;;  %p857_p2 = scmp.ge.s32.totalorder %s637_s17, 1 }
  0x2f   : > { %p197_p5 = pnand %p857_p2, %p856_p1 }
  0x30   : > { %s773_s5 = sand.u32 (!%p197_p5), 1, %s621_s13  }
  0x31   : > { %200 = sbr.rel (%p197_p5) target bundleno = 417 (0x1a1), region = 32  ;;  %s447_s7 = sshll.u32 (!%p197_p5), %s773_s5, 3 }
  0x32   : > { %s203_s11 = scalar_lea.sflag (!%p197_p5), [#allocation4], %s773_s5  ;;  %s206_s9 = scalar_lea.vmem (!%p197_p5), [#allocation3], %s447_s7 }
  0x38   : > { %608 = dma.done.wait (%p709_p8), %s203_s11, 128  }
  0x39   : > { %610 = vsyncadd (%p709_p8), %s203_s11, 4294967168  ;;  %p243_p9 = scmp.lt.s32.totalorder %s629_s15, 1  ;;  %v640_v0 = vmov 0   ;;  %vm292_vm0 = vcmask 7168   ;;  %v266_v4 = vld [vmem:[%s206_s9] sm:$0xff]  ;;  %vm277_vm1 = vcmask 261120   ;;  %v306_v24 = vlaneseq }
  0x3a   : > { %524 = vset.pattern.permute.xlu0 %v640_v0  ;;  %s454_s23 = sshll.u32 %s629_s15, 7  ;;  %s242_s29 = scalar_lea.vmem [#allocation6], %s447_s7 }
  0x3b   : > { %s244_s6 = scalar_select %p243_p9, %s629_s15, 1  ;;  %v307_v25 = vshrl.u32 %v306_v24, 7 }
  0x3c   : > { %s331_s30 = sshll.u32 %s242_s29, 4  ;;  %s318_s15 = scalar_lea.sflag [#allocation5], %s773_s5  ;;  %s799_s30 = int_to_ptr.vmem [resolvable:$true] %s331_s30 }
  0x3d   : > { %s449_s8 = sshll.u32 %s244_s6, 3  ;;  %vm310_vm2 = vcmp.eq.s32.totalorder %v307_v25, 1  ;;  %vm308_vm3 = vcmp.eq.s32.totalorder %v307_v25, 0  ;;  %s797_s6 = scalar_lea.hbm %s849_s3, %s454_s23 }
  0x3e   : > { %s256_s19 = scalar_lea.vmem %s848_s2, %s449_s8  ;;  %s249_s24 = scalar_lea.vmem %s846_s0, %s449_s8 }
  0x3f   : > { %v267_v1 = vld [vmem:[%s256_s19] sm:$0xff]  ;;  %s555_s7 = scalar_lea.vmem %s799_s30, 128  ;;  %p858_p11 = scmp.ne.s32.totalorder %s853_s25, 0 }
  0x40   : > { %273 = vperm.xlu0 %524, %v267_v1   ;;  %v293_v2 = vsel %vm292_vm0, %v267_v1, 0.0  ;;  %v265_v3 = vld [vmem:[%s249_s24] sm:$0xff]  ;;  %p556_p8 = scmp.ne.s32.totalorder %s799_s30, %s555_s7  ;;  %s641_s8 = smov [#allocation6]  }
  0x41   : > { %294 = vadd.xlane.f32.xlu1 %v293_v2  ;;  %v268_v5 = vsub.f32 %v265_v3, %v266_v4  ;;  %s559_s10 = sshll.u32 %s641_s8, 4  ;;  %s560_s10 = int_to_ptr.vmem [resolvable:$false] %s559_s10 }
  0x42   : > { %p557_p0 = pnand %p556_p8, %p858_p11  ;;  %s561_s18 = scalar_lea.vmem %s560_s10, 256 }
  0x43   : > { %v270_v6 = vmul.f32 %v268_v5, %v268_v5  ;;  %p562_p13 = scmp.lt.s32.totalorder %s799_s30, %s560_s10  ;;  %p563_p3 = scmp.lt.s32.totalorder %s561_s18, %s555_s7 }
  0x44   : > { %p558_p7 = pneg %p557_p0 }
  0x45   : > { %p564_p6 = por %p563_p3, %p562_p13 }
  0x47   : > { %p565_p4 = pnand %p564_p6, %p558_p7 }
  0xbf   : > { %v274_v7 = vpop.permute.xlu0 %273 }
  0xc0   : > { %v276_v8 = vmul.f32 %v274_v7, %v270_v6 }
  0xc2   : > { %v278_v9 = vsel %vm277_vm1, %v276_v8, 0.0 }
  0xc3   : > { %279 = vadd.xlane.f32.xlu0 %v278_v9 }
  0xce   : > { %v295_v10 = vpop.xlane.xlu1 %294 }
  0xcf   : > { %v296_v11 = vrot.slane %v295_v10, 4 }
  0xd1   : > { %v297_v12 = vadd.f32 %v296_v11, %v295_v10 }
  0xd3   : > { %v298_v13 = vrot.slane %v297_v12, 2 }
  0xd5   : > { %v299_v17 = vadd.f32 %v298_v13, %v297_v12 }
  0xd7   : > { %v300_v20 = vrot.slane %v299_v17, 1 }
  0xd9   : > { %v301_v23 = vadd.f32 %v300_v20, %v299_v17 }
 0x150   : > { %v280_v14 = vpop.xlane.xlu0 %279 }
 0x151   : > { %v281_v15 = vrot.slane %v280_v14, 4 }
 0x153   : > { %v282_v16 = vadd.f32 %v281_v15, %v280_v14 }
 0x155   : > { %v283_v18 = vrot.slane %v282_v16, 2 }
 0x157   : > { %v284_v19 = vadd.f32 %v283_v18, %v282_v16 }
 0x159   : > { %v285_v21 = vrot.slane %v284_v19, 1 }
 0x15b   : > { %v286_v22 = vadd.f32 %v285_v21, %v284_v19 }
 0x15d   : > { %457 = vpush %v286_v22 }
 0x15e   : > { %459 = vpush %v301_v23 }
 0x18e   : > { %s458_s28 = spop %457 }
 0x18f   : > { %v314_v26 = vstv %s458_s28  ;;  %s460_s4 = spop %459 }
 0x190   : > { %v312_v27 = vstv %s460_s4 }
 0x191   : > { %v313_v28 = vsel %vm310_vm2, %v312_v27, 0.0 }
 0x192   : > { %v315_v29 = vsel %vm308_vm3, %v314_v26, %v313_v28 }
 0x193   : > { %316 = vst [vmem:[%s242_s29] sm:$0xff] %v315_v29 }
 0x194   : > { %568 = shalt.err (!%p565_p4)
}
 0x195   : > { %s569_s5 = scalar_lea.hbm %s797_s6, 128  ;;  %s573_s22 = scalar_lea.hbm %s849_s3, 256 }
 0x196   : > { %p570_p10 = scmp.ne.s32.totalorder %s797_s6, %s569_s5  ;;  %p574_p2 = scmp.lt.u32.totalorder %s797_s6, %s849_s3 }
 0x197   : > { %p575_p5 = scmp.lt.u32.totalorder %s573_s22, %s569_s5  ;;  %p577_p8 = scmp.lt.u32.totalorder %s569_s5, %s797_s6 }
 0x198   : > { %p571_p12 = pnand %p570_p10, %p858_p11 }
 0x199   : > { %p576_p9 = por %p575_p5, %p574_p2 }
 0x19a   : > { %p572_p1 = pneg %p571_p12 }
 0x19b   : > { %p578_p0 = por %p577_p8, %p576_p9 }
 0x19d   : > { %p579_p7 = pnand %p578_p0, %p572_p1 }
 0x19f   : > { %582 = shalt.err (!%p579_p7)
}
 0x1a0   : > { %463 = dma.vmem_to_hbm [thread:$0]  (%p858_p11), %s799_s30, 128, %s797_s6, %s318_s15  }
 0x1a1 PF: > { %s343_s28 = sand.u32 1, %s617_s12   ;;  %p859_p13 = scmp.ne.s32.totalorder %s854_s27, 0 }
 0x1a2   : > { %p860_p3 = scmp.ge.s32.totalorder %s637_s17, 2  ;;  %s344_s29 = scalar_lea.sflag [#allocation5], %s343_s28 }
 0x1a4   : > { %p470_p6 = pnand %p860_p3, %p859_p13 }
 0x1a6   : > { %612 = dma.done.wait (!%p470_p6), %s344_s29, 128  }
 0x1a7   : > { %614 = vsyncadd (!%p470_p6), %s344_s29, 4294967168  ;;  %s19_s17 = sadd.s32 1, %s637_s17   ;;  %s861_s12 = smov %s621_s13 }
 0x1a8   : > { %p16_p4 = scmp.ge.s32.totalorder %s19_s17, 4   ;;  %s862_s13 = smov %s625_s14 }
 0x1a9   : > { %s863_s14 = smov %s718_s26  ;;  %s864_s15 = smov %s633_s16 }
 0x1aa   : > { %s865_s16 = smov %s867_s20  ;;  %18 = sbr.rel (!%p16_p4) target bundleno = 6 (0x6), region = 91 }
 0x1b1   :  { %349 = vsyncpa [#allocation4], 1 }
 0x1b2   :  { %351 = vsyncpa [#allocation4 + $0x1], 1 }
 0x1b3   :  { %352 = vsyncpa [#allocation5], 1 }
 0x1b4   :  { %354 = vsyncpa [#allocation5 + $0x1], 1 }

</bundles_post_ra>
